<compile_context>
chip_gen: v5e
topology: v5e:2x2
jax: 0.10.0
libtpu: 0.0.40
codegen_flags: <defaults>
</compile_context>

<pallas_src>
import math

import jax
import jax.numpy as jnp
from jax.experimental import pallas as pl
from jax.experimental.pallas import tpu as pltpu


def _round_up(x, m):
    return ((x + m - 1) // m) * m


def _tensorcores_per_chip():
    """Best-effort TensorCore count per chip (v7x = 2, v5e/v6e = 1)."""
    try:
        kind = jax.devices()[0].device_kind.lower()
    except Exception:
        return 1
    # v7x has 2 TensorCores per chip; v4 megacore also exposes 2 via
    # "parallel" grid dimensions.  v5e / v6e have 1.
    if "v7" in kind or "v4" in kind:
        return 2
    return 1


def critic_kernel(x_ref, w1_ref, b1_ref, w2_ref, b2_ref, w3r_ref, b3_ref, o_ref):
    # x_ref:(tm, D)    D = S + A  (concat fused in the wrapper)
    # w1:(D,H1) b1:(1,H1)   w2:(H1,H2) b2:(1,H2)
    # w3r:(1,H2) f32 (third-layer weight, transposed)   b3:(1,) scalar in SMEM
    # o_ref:(1, tm)  lane-dense output (batch on the lane axis)
    wdt = w1_ref.dtype                       # bf16 on the fast path, f32 otherwise
    x = x_ref[...].astype(wdt)

    # Layer 1: one K=D matmul on the MXU, f32 accumulation.
    h1 = jnp.dot(x, w1_ref[...], preferred_element_type=jnp.float32) + b1_ref[...]
    h1 = jnp.maximum(h1, 0.0)

    # Layer 2: the FLOP-dominant 256x256 matmul, bf16 operands / f32 accumulate.
    h2 = (jnp.dot(h1.astype(wdt), w2_ref[...], preferred_element_type=jnp.float32)
          + b2_ref[...])
    h2 = jnp.maximum(h2, 0.0)

    # Layer 3: N=1 matmul replaced by VPU multiply + XLU lane-reduce (f32).
    out = jnp.sum(h2 * w3r_ref[...], axis=-1) + b3_ref[0]
    o_ref[...] = out[None, :].astype(o_ref.dtype)


def critic_forward(state, action, params, *, tm=None, weight_dtype=jnp.bfloat16):
    """Pallas-backed Critic forward. state: (B, S), action: (B, A) -> (B, 1).

    weight_dtype: dtype of the two big matmuls' operands (default bf16; pass
    jnp.float32 for an exact-f32 path).  Accumulation is always f32.
    """
    w1, b1, w2, b2, w3, b3 = params
    B, S = state.shape
    A = action.shape[-1]
    D = S + A
    H1 = w1.shape[1]
    H2 = w2.shape[1]

    # Fuse the concat once in the wrapper: one (B, D) input, one K=D matmul.
    x = jnp.concatenate([state, action], axis=-1)

    # Weight preprocessing: cast the matmul weights; keep biases + the
    # VPU-side layer-3 weight in f32; b3 becomes an SMEM scalar.
    if weight_dtype is not None:
        w1c = w1.astype(weight_dtype)
        w2c = w2.astype(weight_dtype)
    else:
        w1c, w2c = w1, w2
    b1c = b1.reshape(1, H1).astype(jnp.float32)
    b2c = b2.reshape(1, H2).astype(jnp.float32)
    w3_row = w3.reshape(1, H2).astype(jnp.float32)   # (H2, 1) -> (1, H2)
    b3_smem = b3.reshape(1).astype(jnp.float32)

    # Batch tiling: single full-height tile for small B (rounded to 16 for
    # bf16 sublane packing); ~512-row tiles for large B; on 2-core chips make
    # sure mid-size batches produce >= 2 parallel grid steps.
    if tm is None:
        cores = _tensorcores_per_chip()
        min_tiles = cores if B >= 256 else 1
        if B <= 512 and min_tiles == 1:
            tm = _round_up(B, 16)
        else:
            n_tiles = max(min_tiles, pl.cdiv(B, 512))
            tm = _round_up(pl.cdiv(B, n_tiles), 16)
    tm = _round_up(tm, 16)

    B_pad = _round_up(B, tm)
    if B_pad != B:
        x = jnp.pad(x, ((0, B_pad - B), (0, 0)))
    num_tiles = B_pad // tm

    # Advisory cost estimate using the ACTUAL dtype sizes.
    act_bytes = x.dtype.itemsize
    w_bytes = w1c.dtype.itemsize
    flops = 2 * B_pad * (D * H1 + H1 * H2 + H2)
    bytes_accessed = (act_bytes * (B_pad * D + B_pad)          # input + output
                      + w_bytes * (D * H1 + H1 * H2)           # big weights
                      + 4 * (H1 + H2 + H2 + 1))                # f32 biases + w3

    whole = lambda i: (0, 0)  # weights/biases: same (whole) block every grid step

    out = pl.pallas_call(
        critic_kernel,
        out_shape=jax.ShapeDtypeStruct((num_tiles, tm), state.dtype),
        grid_spec=pltpu.PrefetchScalarGridSpec(
            num_scalar_prefetch=0,
            grid=(num_tiles,),
            in_specs=[
                pl.BlockSpec((tm, D), lambda i: (i, 0)),            # x tile
                pl.BlockSpec((D, H1), whole),                       # W1
                pl.BlockSpec((1, H1), whole),                       # b1
                pl.BlockSpec((H1, H2), whole),                      # W2
                pl.BlockSpec((1, H2), whole),                       # b2
                pl.BlockSpec((1, H2), whole),                       # W3^T row
                pl.BlockSpec(memory_space=pltpu.MemorySpace.SMEM),  # b3 scalar
            ],
            out_specs=pl.BlockSpec((1, tm), lambda i: (i, 0)),      # lane-dense
        ),
        compiler_params=pltpu.CompilerParams(
            dimension_semantics=("parallel",)),
        cost_estimate=pl.CostEstimate(flops=flops, transcendentals=0,
                                      bytes_accessed=bytes_accessed),
    )(x, w1c, b1c, w2c, b2c, w3_row, b3_smem)

    return out.reshape(-1)[:B].reshape(B, 1)


def init_critic_params(key, state_dim, action_dim, hidden_dims=(256, 256),
                       dtype=jnp.float32):
    """Deterministic PyTorch-style (uniform +-1/sqrt(fan_in)) Linear init."""
    dims = [state_dim + action_dim] + list(hidden_dims) + [1]
    params = []
    for fan_in, fan_out in zip(dims[:-1], dims[1:]):
        key, kw, kb = jax.random.split(key, 3)
        bound = 1.0 / math.sqrt(fan_in)
        w = jax.random.uniform(kw, (fan_in, fan_out), dtype, -bound, bound)
        b = jax.random.uniform(kb, (1, fan_out), dtype, -bound, bound)
        params += [w, b]
    return tuple(params)


def critic_ref(state, action, params):
    """Pure-JAX reference for correctness checking."""
    w1, b1, w2, b2, w3, b3 = params
    x = jnp.concatenate([state, action], axis=-1)
    h = jnp.maximum(x @ w1 + b1, 0.0)
    h = jnp.maximum(h @ w2 + b2, 0.0)
    return h @ w3 + b3


if __name__ == "__main__":
    key = jax.random.PRNGKey(0)
    B, S, A = 16, 16, 16
    hidden_dims = (256, 256)

    kp, ks, ka = jax.random.split(key, 3)
    params = init_critic_params(kp, S, A, hidden_dims)
    state = jax.random.normal(ks, (B, S), jnp.float32)
    action = jax.random.normal(ka, (B, A), jnp.float32)

    ref = critic_ref(state, action, params)

    # Exact-f32 matmul path: tight tolerance against the f32 reference.
    out_f32 = jax.block_until_ready(
        critic_forward(state, action, params, weight_dtype=jnp.float32))
    assert out_f32.shape == (B, 1), out_f32.shape
    assert jnp.allclose(out_f32, ref, atol=1e-4, rtol=1e-4), "f32 path mismatch"

    # Default fast path (bf16 matmul operands, f32 accumulation): loose tolerance.
    out_bf16 = jax.block_until_ready(critic_forward(state, action, params))
    assert out_bf16.shape == (B, 1), out_bf16.shape
    assert jnp.allclose(out_bf16, ref, atol=5e-2, rtol=5e-2), "bf16 path mismatch"

    print("KERNEL_OK")
</pallas_src>

<mosaic_0001>
module attributes {stable_mosaic.version = 11 : i64} {
  func.func @critic_kernel(%arg0: i32, %arg1: memref<16x32xf32, #tpu.memory_space<vmem>>, %arg2: memref<32x256xf32, #tpu.memory_space<vmem>>, %arg3: memref<1x256xf32, #tpu.memory_space<vmem>>, %arg4: memref<256x256xf32, #tpu.memory_space<vmem>>, %arg5: memref<1x256xf32, #tpu.memory_space<vmem>>, %arg6: memref<1x256xf32, #tpu.memory_space<vmem>>, %arg7: memref<1xf32, #tpu.memory_space<smem>>, %arg8: memref<1x16xf32, #tpu.memory_space<vmem>>) attributes {dimension_semantics = [#tpu.dimension_semantics<parallel>], iteration_bounds = array<i64: 1>, scalar_prefetch = 0 : i64, scratch_operands = 0 : i64, tpu.core_type = #tpu.core_type<tc>, window_params = [{transform_indices = @transform_0, window_bounds = array<i64: 16, 32>}, {pipeline_mode = #tpu.pipeline_mode<synchronous>, transform_indices = @transform_1, window_bounds = array<i64: 32, 256>}, {pipeline_mode = #tpu.pipeline_mode<synchronous>, transform_indices = @transform_2, window_bounds = array<i64: 1, 256>}, {pipeline_mode = #tpu.pipeline_mode<synchronous>, transform_indices = @transform_3, window_bounds = array<i64: 256, 256>}, {pipeline_mode = #tpu.pipeline_mode<synchronous>, transform_indices = @transform_4, window_bounds = array<i64: 1, 256>}, {pipeline_mode = #tpu.pipeline_mode<synchronous>, transform_indices = @transform_5, window_bounds = array<i64: 1, 256>}, {transform_indices = @transform_6, window_bounds = array<i64: 1>}, {transform_indices = @transform_7, window_bounds = array<i64: 1, 16>}]} {
    %c0 = arith.constant 0 : index
    %c0_0 = arith.constant 0 : index
    %0 = vector.load %arg1[%c0, %c0_0] : memref<16x32xf32, #tpu.memory_space<vmem>>, vector<16x32xf32>
    %c0_1 = arith.constant 0 : index
    %c0_2 = arith.constant 0 : index
    %1 = vector.load %arg2[%c0_1, %c0_2] : memref<32x256xf32, #tpu.memory_space<vmem>>, vector<32x256xf32>
    %cst = arith.constant dense<0.000000e+00> : vector<16x256xf32>
    %2 = tpu.matmul %0, %1, %cst {dimension_numbers = #tpu.dot_dimension_numbers<[1], [0], [0], [1], [0, 0, 1, 1], [], []>} : vector<16x32xf32>, vector<32x256xf32>, vector<16x256xf32> -> vector<16x256xf32>
    %c0_3 = arith.constant 0 : index
    %c0_4 = arith.constant 0 : index
    %3 = vector.load %arg3[%c0_3, %c0_4] : memref<1x256xf32, #tpu.memory_space<vmem>>, vector<1x256xf32>
    %4 = vector.broadcast %3 : vector<1x256xf32> to vector<16x256xf32>
    %5 = arith.addf %2, %4 : vector<16x256xf32>
    %cst_5 = arith.constant 0.000000e+00 : f32
    %6 = vector.broadcast %cst_5 : f32 to vector<16x256xf32>
    %7 = arith.maximumf %5, %6 : vector<16x256xf32>
    %c0_6 = arith.constant 0 : index
    %c0_7 = arith.constant 0 : index
    %8 = vector.load %arg4[%c0_6, %c0_7] : memref<256x256xf32, #tpu.memory_space<vmem>>, vector<256x256xf32>
    %cst_8 = arith.constant dense<0.000000e+00> : vector<16x256xf32>
    %9 = tpu.matmul %7, %8, %cst_8 {dimension_numbers = #tpu.dot_dimension_numbers<[1], [0], [0], [1], [0, 0, 1, 1], [], []>} : vector<16x256xf32>, vector<256x256xf32>, vector<16x256xf32> -> vector<16x256xf32>
    %c0_9 = arith.constant 0 : index
    %c0_10 = arith.constant 0 : index
    %10 = vector.load %arg5[%c0_9, %c0_10] : memref<1x256xf32, #tpu.memory_space<vmem>>, vector<1x256xf32>
    %11 = vector.broadcast %10 : vector<1x256xf32> to vector<16x256xf32>
    %12 = arith.addf %9, %11 : vector<16x256xf32>
    %cst_11 = arith.constant 0.000000e+00 : f32
    %13 = vector.broadcast %cst_11 : f32 to vector<16x256xf32>
    %14 = arith.maximumf %12, %13 : vector<16x256xf32>
    %c0_12 = arith.constant 0 : index
    %c0_13 = arith.constant 0 : index
    %15 = vector.load %arg6[%c0_12, %c0_13] : memref<1x256xf32, #tpu.memory_space<vmem>>, vector<1x256xf32>
    %16 = vector.broadcast %15 : vector<1x256xf32> to vector<16x256xf32>
    %17 = arith.mulf %14, %16 : vector<16x256xf32>
    %cst_14 = arith.constant dense<0.000000e+00> : vector<16xf32>
    %18 = vector.multi_reduction <add>, %17, %cst_14 [1] : vector<16x256xf32> to vector<16xf32>
    %c0_15 = arith.constant 0 : index
    %19 = memref.load %arg7[%c0_15] : memref<1xf32, #tpu.memory_space<smem>>
    %20 = vector.broadcast %19 : f32 to vector<16xf32>
    %21 = arith.addf %18, %20 : vector<16xf32>
    %22 = vector.shape_cast %21 : vector<16xf32> to vector<1x16xf32>
    %c0_16 = arith.constant 0 : index
    %c0_17 = arith.constant 0 : index
    %23 = vector.load %arg8[%c0_16, %c0_17] : memref<1x16xf32, #tpu.memory_space<vmem>>, vector<1x16xf32>
    tpu.vector_store %arg8[%c0_16, %c0_17], %22 {strides = array<i32>} : memref<1x16xf32, #tpu.memory_space<vmem>>, vector<1x16xf32>,
    return
  }
  func.func @transform_0(%arg0: i32) -> (i32, i32) {
    %c0_i32 = arith.constant 0 : i32
    %c0_i32_0 = arith.constant 0 : i32
    return %arg0, %c0_i32 : i32, i32
  }
  func.func @transform_1(%arg0: i32) -> (i32, i32) {
    %c0_i32 = arith.constant 0 : i32
    %c0_i32_0 = arith.constant 0 : i32
    %c0_i32_1 = arith.constant 0 : i32
    return %c0_i32, %c0_i32_0 : i32, i32
  }
  func.func @transform_2(%arg0: i32) -> (i32, i32) {
    %c0_i32 = arith.constant 0 : i32
    %c0_i32_0 = arith.constant 0 : i32
    %c0_i32_1 = arith.constant 0 : i32
    return %c0_i32, %c0_i32_0 : i32, i32
  }
  func.func @transform_3(%arg0: i32) -> (i32, i32) {
    %c0_i32 = arith.constant 0 : i32
    %c0_i32_0 = arith.constant 0 : i32
    %c0_i32_1 = arith.constant 0 : i32
    return %c0_i32, %c0_i32_0 : i32, i32
  }
  func.func @transform_4(%arg0: i32) -> (i32, i32) {
    %c0_i32 = arith.constant 0 : i32
    %c0_i32_0 = arith.constant 0 : i32
    %c0_i32_1 = arith.constant 0 : i32
    return %c0_i32, %c0_i32_0 : i32, i32
  }
  func.func @transform_5(%arg0: i32) -> (i32, i32) {
    %c0_i32 = arith.constant 0 : i32
    %c0_i32_0 = arith.constant 0 : i32
    %c0_i32_1 = arith.constant 0 : i32
    return %c0_i32, %c0_i32_0 : i32, i32
  }
  func.func @transform_6(%arg0: i32) -> i32 {
    %c0_i32 = arith.constant 0 : i32
    %c0_i32_0 = arith.constant 0 : i32
    return %c0_i32 : i32
  }
  func.func @transform_7(%arg0: i32) -> (i32, i32) {
    %c0_i32 = arith.constant 0 : i32
    %c0_i32_0 = arith.constant 0 : i32
    return %arg0, %c0_i32 : i32, i32
  }
}

</mosaic_0001>

<bundles_post_ra>
// kernel: tpu_custom_call.1
= control target key start
LH: loop header
LB: loop body
LE: loop exit
PB: predicated region body
PF: predicated region fallthrough
CT: control target
= control target key end

     0   :  { %13 = vsyncpa [#allocation4], 0  ;;  %s554_s0 = inlined_call_operand.hbm [shape: f32[16,32], index: 0, kind: input, shape index: {}]   ;;  %s555_s1 = inlined_call_operand.hbm [shape: f32[32,256], index: 1, kind: input, shape index: {}]   ;;  %s556_s2 = inlined_call_operand.vmem [shape: f32[1,256], index: 2, kind: input, shape index: {}]   ;;  %s557_s3 = inlined_call_operand.hbm [shape: f32[256,256], index: 3, kind: input, shape index: {}]   ;;  %s558_s4 = inlined_call_operand.vmem [shape: f32[1,256], index: 4, kind: input, shape index: {}]   ;;  %s559_s5 = inlined_call_operand.vmem [shape: f32[1,256], index: 5, kind: input, shape index: {}]   ;;  %s560_s6 = inlined_call_operand.<no memory space> [shape: f32[1], index: 6, kind: input, shape index: {}]   ;;  %s561_s7 = inlined_call_operand.hbm [shape: f32[1,16], index: 7, kind: output, shape index: {}]  }
   0x1   :  { %14 = vsyncpa [#allocation7], 0  ;;  %s33_s26 = sshll.u32 %s555_s1, 4  ;;  %s34_s26 = int_to_ptr.hbm [resolvable:$true] %s33_s26 }
   0x2   :  { %15 = vsyncpa [#allocation5], 0  ;;  %s478_s27 = smov [#allocation6]   ;;  %s20_s8 = sshll.u32 %s554_s0, 4  ;;  %s21_s8 = int_to_ptr.hbm [resolvable:$true] %s20_s8 }
   0x3   :  { %s35_s28 = sshll.u32 %s478_s27, 4  ;;  %s479_s9 = smov 256   ;;  %s36_s28 = int_to_ptr.vmem [resolvable:$true] %s35_s28 }
   0x4   :  { %s480_s10 = smov 16   ;;  %s481_s11 = smov [#allocation3]  }
   0x5   :  { %41 = dma.hbm_to_vmem [thread:$0]  %s34_s26, 1024, %s36_s28, [#allocation7], %s479_s9, %s479_s9, %s480_s10  }
   0x6   :  { %s22_s12 = sshll.u32 %s481_s11, 4  ;;  %s482_s13 = smov 128   ;;  %s23_s12 = int_to_ptr.vmem [resolvable:$true] %s22_s12 }
   0x7   :  { %s483_s14 = smov 8   ;;  %s48_s16 = sshll.u32 %s557_s3, 4  ;;  %s49_s16 = int_to_ptr.hbm [resolvable:$true] %s48_s16 }
   0x8   :  { %28 = dma.hbm_to_vmem [thread:$0]  %s21_s8, 256, %s23_s12, [#allocation4], %s482_s13, %s482_s13, %s483_s14  }
   0x9   :  { %s484_s17 = smov [#allocation8]  }
   0xa   :  { %s50_s18 = sshll.u32 %s484_s17, 4  ;;  %s51_s18 = int_to_ptr.vmem [resolvable:$true] %s50_s18 }
   0xb   :  { %56 = dma.hbm_to_vmem [thread:$0]  %s49_s16, 8192, %s51_s18, [#allocation7], %s479_s9, %s479_s9, %s480_s10  }
   0xc   :  { %472 = dma.done.wait [#allocation4], 256  }
   0xd   :  { %473 = vsyncadd [#allocation4], 4294967040 }
   0xe   :  { %474 = dma.done.wait [#allocation7], 9216  }
   0xf   :  { %475 = vsyncadd [#allocation7], 4294958080  ;;  %v83_v0 = vld [vmem:[#allocation6 + $0x30] sm:$0xff]  ;;  %v81_v1 = vld [vmem:[#allocation6 + $0x20] sm:$0xff]  ;;  %vm91_vm0 = vcmask 261120   ;;  %s485_s22 = smov [#allocation9]  }
  0x10   :  { %v84_v2 = vld [vmem:[#allocation6 + $0x38] sm:$0xff]  ;;  %110 = vmatpush.msra.mxu0 %v83_v0  ;;  %v82_v3 = vld [vmem:[#allocation6 + $0x28] sm:$0xff]  ;;  %v79_v4 = vld [vmem:[#allocation6 + $0x10] sm:$0xff]  ;;  %s351_s23 = sshll.u32 %s485_s22, 4  ;;  %s353_s26 = sshll.u32 %s561_s7, 4  ;;  %vm341_vm1 = vcmask 130112   ;;  %s352_s23 = int_to_ptr.vmem [resolvable:$true] %s351_s23  ;;  %s354_s26 = int_to_ptr.hbm [resolvable:$true] %s353_s26 }
  0x11   :  { %133 = vmatpush.msra.mxu1 %v84_v2  ;;  %v80_v5 = vld [vmem:[#allocation6 + $0x18] sm:$0xff]  ;;  %v77_v6 = vld [vmem:[#allocation6] sm:$0xff]  ;;  %v178_v7 = vld [vmem:[#allocation8 + $0xf0] sm:$0xff]  ;;  %vm344_vm2 = vcmask 122880  }
  0x12   :  { %111 = vmatpush.msra.mxu0 %v81_v1  ;;  %v78_v8 = vld [vmem:[#allocation6 + $0x8] sm:$0xff]  ;;  %218 = vmatpush.msra.mxu2 %v178_v7  ;;  %v176_v9 = vld [vmem:[#allocation8 + $0xe0] sm:$0xff]  ;;  %v210_v10 = vld [vmem:[#allocation8 + $0x1f0] sm:$0xff] }
  0x13   :  { %134 = vmatpush.msra.mxu1 %v82_v3  ;;  %v75_v11 = vld [vmem:[#allocation3] sm:$0xff]  ;;  %v179_v12 = vld [vmem:[#allocation8 + $0xf8] sm:$0xff]  ;;  %241 = vmatpush.msra.mxu3 %v210_v10  ;;  %v208_v15 = vld [vmem:[#allocation8 + $0x1e0] sm:$0xff] }
  0x14   :  { %112 = vmatpush.msra.mxu0 %v79_v4  ;;  %219 = vmatpush.msra.mxu2 %v176_v9  ;;  %v211_v13 = vld [vmem:[#allocation8 + $0x1f8] sm:$0xff]  ;;  %v174_v14 = vld [vmem:[#allocation8 + $0xd0] sm:$0xff]  ;;  %v177_v16 = vld [vmem:[#allocation8 + $0xe8] sm:$0xff] }
  0x15   :  { %135 = vmatpush.msra.mxu1 %v80_v5  ;;  %v209_v17 = vld [vmem:[#allocation8 + $0x1e8] sm:$0xff]  ;;  %v172_v18 = vld [vmem:[#allocation8 + $0xc0] sm:$0xff]  ;;  %v206_v19 = vld [vmem:[#allocation8 + $0x1d0] sm:$0xff]  ;;  %242 = vmatpush.msra.mxu3 %v208_v15 }
  0x16   :  { %113 = vmatpush.msra.mxu0 %v77_v6  ;;  %220 = vmatpush.msra.mxu2 %v174_v14  ;;  %v175_v20 = vld [vmem:[#allocation8 + $0xd8] sm:$0xff]  ;;  %v170_v22 = vld [vmem:[#allocation8 + $0xb0] sm:$0xff]  ;;  %v204_v23 = vld [vmem:[#allocation8 + $0x1c0] sm:$0xff] }
  0x17   :  { %136 = vmatpush.msra.mxu1 %v78_v8  ;;  %364 = vmatmul.msk.f32.vlgmr.msra.gmra.mxu0 %vm91_vm0, %v75_v11  ;;  %v207_v21 = vld [vmem:[#allocation8 + $0x1d8] sm:$0xff]  ;;  %v173_v24 = vld [vmem:[#allocation8 + $0xc8] sm:$0xff]  ;;  %v168_v28 = vld [vmem:[#allocation8 + $0xa0] sm:$0xff] }
  0x18   :  { %366 = vmatmul.msk.f32.vlgmr.msra.gmra.mxu1 %vm91_vm0, %v75_v11  ;;  %264 = vmatpush.msrb.mxu0 %v179_v12  ;;  %v205_v25 = vld [vmem:[#allocation8 + $0x1c8] sm:$0xff]  ;;  %v76_v26 = vld [vmem:[#allocation3 + $0x8] sm:$0xff]  ;;  %v202_v29 = vld [vmem:[#allocation8 + $0x1b0] sm:$0xff] }
  0x19   :  { %287 = vmatpush.msrb.mxu1 %v211_v13  ;;  %221 = vmatpush.msra.mxu2 %v172_v18  ;;  %v171_v27 = vld [vmem:[#allocation8 + $0xb8] sm:$0xff]  ;;  %v169_v31 = vld [vmem:[#allocation8 + $0xa8] sm:$0xff]  ;;  %v166_v32 = vld [vmem:[#allocation8 + $0x90] sm:$0xff] }
  0x1a   :  { %265 = vmatpush.msrb.mxu0 %v177_v16  ;;  %243 = vmatpush.msra.mxu3 %v206_v19  ;;  %v203_v30 = vld [vmem:[#allocation8 + $0x1b8] sm:$0xff]  ;;  %v200_v33 = vld [vmem:[#allocation8 + $0x1a0] sm:$0xff]  ;;  %v201_v34 = vld [vmem:[#allocation8 + $0x1a8] sm:$0xff] }
  0x1b   :  { %288 = vmatpush.msrb.mxu1 %v209_v17  ;;  %222 = vmatpush.msra.mxu2 %v170_v22  ;;  %v167_v35 = vld [vmem:[#allocation8 + $0x98] sm:$0xff]  ;;  %v164_v36 = vld [vmem:[#allocation8 + $0x80] sm:$0xff]  ;;  %v198_v37 = vld [vmem:[#allocation8 + $0x190] sm:$0xff] }
  0x1c   :  { %266 = vmatpush.msrb.mxu0 %v175_v20  ;;  %244 = vmatpush.msra.mxu3 %v204_v23  ;;  %v199_v38 = vld [vmem:[#allocation8 + $0x198] sm:$0xff]  ;;  %v165_v39 = vld [vmem:[#allocation8 + $0x88] sm:$0xff]  ;;  %v162_v40 = vld [vmem:[#allocation8 + $0x70] sm:$0xff] }
  0x1d   :  { %289 = vmatpush.msrb.mxu1 %v207_v21  ;;  %223 = vmatpush.msra.mxu2 %v168_v28  ;;  %v196_v41 = vld [vmem:[#allocation8 + $0x180] sm:$0xff]  ;;  %v197_v42 = vld [vmem:[#allocation8 + $0x188] sm:$0xff]  ;;  %v163_v43 = vld [vmem:[#allocation8 + $0x78] sm:$0xff] }
  0x1e   :  { %267 = vmatpush.msrb.mxu0 %v173_v24  ;;  %245 = vmatpush.msra.mxu3 %v202_v29  ;;  %v160_v44 = vld [vmem:[#allocation8 + $0x60] sm:$0xff]  ;;  %v194_v45 = vld [vmem:[#allocation8 + $0x170] sm:$0xff]  ;;  %v195_v46 = vld [vmem:[#allocation8 + $0x178] sm:$0xff] }
  0x1f   :  { %290 = vmatpush.msrb.mxu1 %v205_v25  ;;  %365 = vmatmul.msk.f32.gmra.mxu0 %vm91_vm0, %v76_v26  ;;  %v161_v47 = vld [vmem:[#allocation8 + $0x68] sm:$0xff]  ;;  %v158_v48 = vld [vmem:[#allocation8 + $0x50] sm:$0xff]  ;;  %v192_v49 = vld [vmem:[#allocation8 + $0x160] sm:$0xff] }
  0x20   :  { %367 = vmatmul.msk.f32.gmra.mxu1 %vm91_vm0, %v76_v26  ;;  %268 = vmatpush.msrb.mxu0 %v171_v27  ;;  %v193_v50 = vld [vmem:[#allocation8 + $0x168] sm:$0xff]  ;;  %v159_v51 = vld [vmem:[#allocation8 + $0x58] sm:$0xff]  ;;  %v156_v52 = vld [vmem:[#allocation8 + $0x40] sm:$0xff] }
  0x21   :  { %291 = vmatpush.msrb.mxu1 %v203_v30  ;;  %224 = vmatpush.msra.mxu2 %v166_v32  ;;  %v190_v53 = vld [vmem:[#allocation8 + $0x150] sm:$0xff]  ;;  %v191_v54 = vld [vmem:[#allocation8 + $0x158] sm:$0xff]  ;;  %v157_v55 = vld [vmem:[#allocation8 + $0x48] sm:$0xff] }
  0x22   :  { %269 = vmatpush.msrb.mxu0 %v169_v31  ;;  %246 = vmatpush.msra.mxu3 %v200_v33  ;;  %v154_v56 = vld [vmem:[#allocation8 + $0x30] sm:$0xff]  ;;  %v188_v57 = vld [vmem:[#allocation8 + $0x140] sm:$0xff]  ;;  %v189_v58 = vld [vmem:[#allocation8 + $0x148] sm:$0xff] }
  0x23   :  { %292 = vmatpush.msrb.mxu1 %v201_v34  ;;  %225 = vmatpush.msra.mxu2 %v164_v36  ;;  %v155_v59 = vld [vmem:[#allocation8 + $0x38] sm:$0xff]  ;;  %v152_v60 = vld [vmem:[#allocation8 + $0x20] sm:$0xff]  ;;  %v186_v61 = vld [vmem:[#allocation8 + $0x130] sm:$0xff] }
  0x24   :  { %270 = vmatpush.msrb.mxu0 %v167_v35  ;;  %247 = vmatpush.msra.mxu3 %v198_v37  ;;  %v153_v62 = vld [vmem:[#allocation8 + $0x28] sm:$0xff]  ;;  %v187_v63 = vld [vmem:[#allocation8 + $0x138] sm:$0xff]  ;;  %v150_v0 = vld [vmem:[#allocation8 + $0x10] sm:$0xff] }
  0x25   :  { %293 = vmatpush.msrb.mxu1 %v199_v38  ;;  %226 = vmatpush.msra.mxu2 %v162_v40  ;;  %v184_v1 = vld [vmem:[#allocation8 + $0x120] sm:$0xff]  ;;  %v151_v2 = vld [vmem:[#allocation8 + $0x18] sm:$0xff]  ;;  %v185_v3 = vld [vmem:[#allocation8 + $0x128] sm:$0xff] }
  0x26   :  { %271 = vmatpush.msrb.mxu0 %v165_v39  ;;  %248 = vmatpush.msra.mxu3 %v196_v41  ;;  %v148_v4 = vld [vmem:[#allocation8] sm:$0xff]  ;;  %v182_v5 = vld [vmem:[#allocation8 + $0x110] sm:$0xff]  ;;  %v149_v6 = vld [vmem:[#allocation8 + $0x8] sm:$0xff] }
  0x27   :  { %294 = vmatpush.msrb.mxu1 %v197_v42  ;;  %227 = vmatpush.msra.mxu2 %v160_v44  ;;  %v183_v7 = vld [vmem:[#allocation8 + $0x118] sm:$0xff]  ;;  %v180_v8 = vld [vmem:[#allocation8 + $0x100] sm:$0xff]  ;;  %v181_v9 = vld [vmem:[#allocation8 + $0x108] sm:$0xff] }
  0x28   :  { %272 = vmatpush.msrb.mxu0 %v163_v43  ;;  %249 = vmatpush.msra.mxu3 %v194_v45  ;;  %v85_v10 = vld [vmem:[%s556_s2] sm:$0x3] }
  0x29   :  { %295 = vmatpush.msrb.mxu1 %v195_v46  ;;  %228 = vmatpush.msra.mxu2 %v158_v48  ;;  %v87_v11 = vperm.slane %v85_v10, 0  ;;  %v88_v12 = vperm.slane %v85_v10, 1  ;;  %v212_v25 = vld [vmem:[%s558_s4] sm:$0x3] }
  0x2a   :  { %273 = vmatpush.msrb.mxu0 %v161_v47  ;;  %250 = vmatpush.msra.mxu3 %v192_v49  ;;  %v215_v26 = vperm.slane %v212_v25, 1  ;;  %v214_v30 = vperm.slane %v212_v25, 0  ;;  %v314_v32 = vld [vmem:[%s559_s5] sm:$0x3] }
  0x2b   :  { %296 = vmatpush.msrb.mxu1 %v193_v50  ;;  %229 = vmatpush.msra.mxu2 %v156_v52  ;;  %v317_v37 = vperm.slane %v314_v32, 1  ;;  %v316_v41 = vperm.slane %v314_v32, 0 }
  0x2c   :  { %274 = vmatpush.msrb.mxu0 %v159_v51  ;;  %251 = vmatpush.msra.mxu3 %v190_v53 }
  0x2d   :  { %297 = vmatpush.msrb.mxu1 %v191_v54  ;;  %230 = vmatpush.msra.mxu2 %v154_v56 }
  0x2e   :  { %275 = vmatpush.msrb.mxu0 %v157_v55  ;;  %252 = vmatpush.msra.mxu3 %v188_v57 }
  0x2f   :  { %298 = vmatpush.msrb.mxu1 %v189_v58  ;;  %231 = vmatpush.msra.mxu2 %v152_v60  ;;  %v336_v58 = vlaneseq }
  0x30   :  { %276 = vmatpush.msrb.mxu0 %v155_v59  ;;  %253 = vmatpush.msra.mxu3 %v186_v61  ;;  %v331_v59 = vstv %s560_s6 }
  0x31   :  { %299 = vmatpush.msrb.mxu1 %v187_v63  ;;  %232 = vmatpush.msra.mxu2 %v150_v0  ;;  %v337_v60 = vand.u32 127, %v336_v58 }
  0x32   :  { %277 = vmatpush.msrb.mxu0 %v153_v62  ;;  %254 = vmatpush.msra.mxu3 %v184_v1 }
  0x33   :  { %300 = vmatpush.msrb.mxu1 %v185_v3  ;;  %233 = vmatpush.msra.mxu2 %v148_v4  ;;  %v339_v62 = vadd.s32 4294967288, %v337_v60 }
  0x34   :  { %278 = vmatpush.msrb.mxu0 %v151_v2  ;;  %255 = vmatpush.msra.mxu3 %v182_v5 }
  0x35   :  { %301 = vmatpush.msrb.mxu1 %v183_v7 }
  0x36   :  { %279 = vmatpush.msrb.mxu0 %v149_v6  ;;  %256 = vmatpush.msra.mxu3 %v180_v8 }
  0x37   :  { %302 = vmatpush.msrb.mxu1 %v181_v9 }
  0x94   :  { %v115_v13 = vpop.f32.mrf.mxu0 }
  0x95   :  { %v138_v14 = vpop.f32.mrf.mxu1  ;;  %v116_v15 = vadd.f32 %v115_v13, %v87_v11 }
  0x96   :  { %v139_v16 = vadd.f32 %v138_v14, %v88_v12 }
  0x97   :  { %v144_v17 = vmax.f32 %v116_v15, 0.0 }
  0x98   :  { %v145_v18 = vmax.f32 %v139_v16, 0.0 }
  0x99   :  { %234 = vmatmul.f32.vlgmr.msra.gmra.mxu2 %v144_v17  ;;  %280 = vmatmul.f32.vlgmr.msrb.gmra.mxu0 %v144_v17 }
  0x9a   :  { %257 = vmatmul.f32.vlgmr.msra.gmra.mxu3 %v145_v18  ;;  %303 = vmatmul.f32.vlgmr.msrb.gmra.mxu1 %v145_v18 }
  0x9c   :  { %v118_v19 = vpop.f32.mrf.mxu0 }
  0x9d   :  { %v141_v20 = vpop.f32.mrf.mxu1  ;;  %v119_v21 = vadd.f32 %v118_v19, %v87_v11 }
  0x9e   :  { %v142_v22 = vadd.f32 %v141_v20, %v88_v12 }
  0x9f   :  { %v146_v23 = vmax.f32 %v119_v21, 0.0 }
  0xa0   :  { %v147_v24 = vmax.f32 %v142_v22, 0.0 }
  0xa1   :  { %237 = vmatmul.f32.gmra.mxu2 %v146_v23  ;;  %283 = vmatmul.f32.gmra.mxu0 %v146_v23 }
  0xa2   :  { %260 = vmatmul.f32.gmra.mxu3 %v147_v24  ;;  %306 = vmatmul.f32.gmra.mxu1 %v147_v24 }
 0x116   :  { %v281_v27 = vpop.f32.mrf.mxu0 }
 0x117   :  { %v282_v28 = vadd.f32 %v281_v27, %v215_v26  ;;  %v304_v29 = vpop.f32.mrf.mxu1 }
 0x119   :  { %v305_v31 = vadd.f32 %v304_v29, %v282_v28 }
 0x11b   :  { %v311_v38 = vmax.f32 %v305_v31, 0.0 }
 0x11c   :  { %v235_v33 = vpop.f32.mrf.mxu2 }
 0x11d   :  { %v236_v34 = vadd.f32 %v235_v33, %v214_v30  ;;  %v258_v35 = vpop.f32.mrf.mxu3  ;;  %v321_v46 = vmul.f32 %v317_v37, %v311_v38 }
 0x11e   :  { %v284_v36 = vpop.f32.mrf.mxu0 }
 0x11f   :  { %v259_v39 = vadd.f32 %v258_v35, %v236_v34  ;;  %v285_v40 = vadd.f32 %v284_v36, %v215_v26  ;;  %v307_v42 = vpop.f32.mrf.mxu1 }
 0x121   :  { %v310_v43 = vmax.f32 %v259_v39, 0.0  ;;  %v308_v44 = vadd.f32 %v307_v42, %v285_v40 }
 0x123   :  { %v320_v45 = vmul.f32 %v316_v41, %v310_v43  ;;  %v313_v51 = vmax.f32 %v308_v44, 0.0 }
 0x124   :  { %v238_v47 = vpop.f32.mrf.mxu2 }
 0x125   :  { %v239_v48 = vadd.f32 %v238_v47, %v214_v30  ;;  %v261_v49 = vpop.f32.mrf.mxu3  ;;  %v324_v50 = vadd.f32 %v321_v46, %v320_v45  ;;  %v323_v54 = vmul.f32 %v317_v37, %v313_v51 }
 0x127   :  { %v262_v52 = vadd.f32 %v261_v49, %v239_v48  ;;  %325 = vadd.xlane.f32.xlu0 %v324_v50 }
 0x129   :  { %v312_v53 = vmax.f32 %v262_v52, 0.0 }
 0x12b   :  { %v322_v55 = vmul.f32 %v316_v41, %v312_v53 }
 0x12d   :  { %v327_v56 = vadd.f32 %v323_v54, %v322_v55 }
 0x12f   :  { %328 = vadd.xlane.f32.xlu0 %v327_v56 }
 0x19a   :  { %v326_v57 = vpop.xlane.xlu0 %325 }
 0x19b   :  { %v332_v61 = vadd.f32 %v331_v59, %v326_v57 }
 0x19d   :  { %v338_v1 = vperm.slane %v332_v61, %v337_v60 }
 0x1a2   :  { %v329_v63 = vpop.xlane.xlu0 %328 }
 0x1a3   :  { %v333_v0 = vadd.f32 %v331_v59, %v329_v63 }
 0x1a5   :  { %v340_v2 = vperm.slane %v333_v0, %v339_v62 }
 0x1a7   :  { %v342_v3 = vsel %vm341_vm1, %v340_v2, %v338_v1 }
 0x1a8   :  { %345 = vst.msk [vmem:[#allocation9] sm:$0x1] %vm344_vm2, %v342_v3 }
 0x1a9   :  { %356 = dma.vmem_to_hbm [thread:$0]  %s352_s23, 16, %s354_s26, [#allocation5]  }
 0x1aa   :  { %476 = dma.done.wait [#allocation5], 16  }
 0x1ab   :  { %477 = vsyncadd [#allocation5], 4294967280 }
 0x1ac   :  { %361 = vsyncpa [#allocation4], 1 }
 0x1ad   :  { %362 = vsyncpa [#allocation7], 1 }
 0x1ae   :  { %363 = vsyncpa [#allocation5], 1 }

</bundles_post_ra>
